<compile_context>
chip_gen: v7x
topology: tpu7x:2x2x1
jax: 0.10.0
libtpu: 0.0.40
codegen_flags: <defaults>
</compile_context>

<pallas_src>
import functools

import jax
import jax.numpy as jnp
from jax.experimental import pallas as pl
from jax.experimental.pallas import tpu as pltpu

_LANE = 128
_SUBLANE = 8
_TARGET_BLOCK_BYTES = 4 * 2 ** 20      # ~4 MiB per input per grid step
_WR_RESIDENT_MAX_BYTES = 4 * 2 ** 20   # keep the rank weight VMEM-resident up to this
_VMEM_CAP_BYTES = 48 * 2 ** 20         # v7x: 64 MiB physical / TC -> leave headroom


# ----------------------------------------------------------------------------- kernel
def classifier_kernel(x1_ref, x2_ref, wr_ref, pk_ref, out_ref, acc1_ref, acc2_ref,
                      *, wr_resident):
    k = pl.program_id(1)
    nk = pl.num_programs(1)

    @pl.when(k == 0)
    def _init():
        acc1_ref[...] = jnp.zeros_like(acc1_ref)
        acc2_ref[...] = jnp.zeros_like(acc2_ref)

    # rank(images): lane-dense VPU multiply + lane reduction over the D tile.
    td = x1_ref.shape[1]
    if wr_resident:
        # Whole padded weight row is resident in VMEM (DMA'd once); slice the
        # current 128-aligned D tile out of it.
        start = pl.multiple_of(k * td, _LANE)
        wr = wr_ref[:, pl.ds(start, td)]                   # (1, TD) f32
    else:
        wr = wr_ref[...]                                   # (1, TD) f32
    x1 = x1_ref[...].astype(jnp.float32)                   # (TB, TD)
    x2 = x2_ref[...].astype(jnp.float32)
    acc1_ref[...] += jnp.sum(x1 * wr, axis=-1, keepdims=True)   # (TB, 1)
    acc2_ref[...] += jnp.sum(x2 * wr, axis=-1, keepdims=True)

    @pl.when(k == nk - 1)
    def _epilogue():
        pk = pk_ref[...]                                   # (8, 128) packed params
        # row 0: [fw1, -fw1, gw1, -gw1]  (sign of +/-d folded into the weights)
        # row 1: [fb1,  fb1, gb1,  gb1]
        # row 2: [fw2,  fw2, gw2,  gw2]
        # row 3: [fb2, gb2, br, 0...]
        w1s = pk[0:1, 0:64]
        b1c = pk[1:2, 0:64]
        w2c = pk[2:3, 0:64]
        fb2 = pk[3:4, 0:1]
        gb2 = pk[3:4, 1:2]
        br = pk[3:4, 2:3]

        s1 = acc1_ref[...] + br                            # (TB, 1)
        s2 = acc2_ref[...] + br
        d = s1 - s2                                        # (TB, 1)

        # One fused sigmoid pass for f(d), f(-d), g(d), g(-d).
        h = jax.nn.sigmoid(d * w1s + b1c)                  # (TB, 64)
        hw = h * w2c
        px = jnp.sum(hw[:, 0:16], axis=-1, keepdims=True) + fb2          # f(d)
        pnx = jnp.sum(hw[:, 16:32], axis=-1, keepdims=True) + fb2        # f(-d)
        gx = jnp.sum(hw[:, 32:64], axis=-1, keepdims=True) + 2.0 * gb2   # g(d)+g(-d)

        logits = jnp.concatenate([px, gx, pnx], axis=-1)                 # (TB, 3)
        m = jnp.max(logits, axis=-1, keepdims=True)
        e = jnp.exp(logits - m)
        probs = e / jnp.sum(e, axis=-1, keepdims=True)

        # Lane-dense packed output: [p0, p1, p2, s1, s2, 0 ... 0] -> (TB, 128).
        pad = jnp.zeros((probs.shape[0], _LANE - 5), jnp.float32)
        out_ref[...] = jnp.concatenate([probs, s1, s2, pad], axis=-1)


# ----------------------------------------------------------------------------- tiling
def _pick_batch_tile(B):
    if B % _SUBLANE != 0:
        # Small / ragged batch: single batch tile (block dim equals full array dim).
        return B
    TB = _SUBLANE
    for cand in (256, 128, 64, 32, 16, 8):
        if B % cand == 0:
            TB = cand
            break
    # v7x megacore: keep >= 2 batch tiles on the "parallel" axis when B >= 16.
    if B >= 16 and B // TB < 2:
        TB //= 2
    return TB


def _pick_d_tile(TB, D_pad, target_bytes):
    # Largest multiple-of-128 divisor of D_pad such that TB*TD*4 <= target_bytes.
    max_td = max(_LANE, (target_bytes // (TB * 4)) // _LANE * _LANE)
    if D_pad <= max_td:
        return D_pad
    td = max_td
    while td >= _LANE:
        if D_pad % td == 0:
            return td
        td -= _LANE
    return _LANE


def _pack_params(params):
    f32 = jnp.float32
    w1s = jnp.concatenate(
        [params["fw1"], -params["fw1"], params["gw1"], -params["gw1"]], axis=1)
    b1c = jnp.concatenate(
        [params["fb1"], params["fb1"], params["gb1"], params["gb1"]], axis=1)
    w2c = jnp.concatenate(
        [params["fw2"], params["fw2"], params["gw2"], params["gw2"]], axis=1)
    row3 = jnp.concatenate([params["fb2"], params["gb2"], params["br"]], axis=1)
    blob = jnp.zeros((8, 128), f32)
    blob = blob.at[0:1, 0:64].set(w1s.astype(f32))
    blob = blob.at[1:2, 0:64].set(b1c.astype(f32))
    blob = blob.at[2:3, 0:64].set(w2c.astype(f32))
    blob = blob.at[3:4, 0:3].set(row3.astype(f32))
    return blob


# ----------------------------------------------------------------------------- wrapper
def classifier_forward(image1, image2, imaget, params,
                       *, target_block_bytes=_TARGET_BLOCK_BYTES):
    """Pallas equivalent of Classifier.forward(image1, image2, imaget)."""
    # NOTE: `truth_combined = cat([imaget, imaget])` in the torch code is computed
    # but never used downstream; it contributes nothing to the outputs.
    del imaget
    B = image1.shape[0]
    D = 1
    for s in image1.shape[1:]:
        D *= s
    # Reshape only (free); no dtype cast here -- the kernel upcasts each block,
    # so bf16 / int8 images stream at fewer HBM bytes.
    x1 = image1.reshape(B, D)
    x2 = image2.reshape(B, D)
    wr = params["wr"].astype(jnp.float32).reshape(1, D)

    # Pad D to a multiple of 128: zero-padded weight keeps the dot product exact
    # and guarantees lane-aligned, pipelineable blocks for any image size.
    D_pad = ((D + _LANE - 1) // _LANE) * _LANE
    if D_pad != D:
        x1 = jnp.pad(x1, ((0, 0), (0, D_pad - D)))
        x2 = jnp.pad(x2, ((0, 0), (0, D_pad - D)))
        wr = jnp.pad(wr, ((0, 0), (0, D_pad - D)))

    blob = _pack_params(params)                            # (8, 128) f32

    TB = _pick_batch_tile(B)
    TD = _pick_d_tile(TB, D_pad, target_block_bytes)
    grid = (B // TB, D_pad // TD)

    # Rank weight: resident full row (DMA'd once) when it fits the budget,
    # otherwise stream (1, TD) tiles alongside the images.
    wr_resident = (D_pad * 4) <= _WR_RESIDENT_MAX_BYTES
    if wr_resident:
        wr_spec = pl.BlockSpec((1, D_pad), lambda i, k: (0, 0))
    else:
        wr_spec = pl.BlockSpec((1, TD), lambda i, k: (0, k))

    # VMEM budget from the actual double-buffered footprint, capped for v7x.
    bytes_in = 2 * 2 * TB * TD * 4                         # x1, x2, 2-deep pipeline
    bytes_wr = 2 * (D_pad if wr_resident else TD) * 4
    bytes_out = 2 * TB * _LANE * 4
    bytes_misc = 2 * 8 * _LANE * 4 + 2 * max(_SUBLANE, TB) * _LANE * 4
    vmem_limit = int(min(
        _VMEM_CAP_BYTES,
        max(16 * 2 ** 20, bytes_in + bytes_wr + bytes_out + bytes_misc + 8 * 2 ** 20)))

    kernel = functools.partial(classifier_kernel, wr_resident=wr_resident)

    packed = pl.pallas_call(
        kernel,
        out_shape=jax.ShapeDtypeStruct((B, _LANE), jnp.float32),
        grid_spec=pltpu.PrefetchScalarGridSpec(
            num_scalar_prefetch=0,
            grid=grid,
            in_specs=[
                pl.BlockSpec((TB, TD), lambda i, k: (i, k)),    # x1
                pl.BlockSpec((TB, TD), lambda i, k: (i, k)),    # x2
                wr_spec,                                        # rank weight
                pl.BlockSpec((8, _LANE), lambda i, k: (0, 0)),  # packed head params
            ],
            out_specs=pl.BlockSpec((TB, _LANE), lambda i, k: (i, 0)),
            scratch_shapes=[
                pltpu.VMEM((TB, 1), jnp.float32),               # s1 accumulator
                pltpu.VMEM((TB, 1), jnp.float32),               # s2 accumulator
            ],
        ),
        compiler_params=pltpu.CompilerParams(
            dimension_semantics=("parallel", "arbitrary"),
            vmem_limit_bytes=vmem_limit,
        ),
    )(x1, x2, wr, blob)

    probs = packed[:, 0:3]
    score1 = packed[:, 3:4]
    score2 = packed[:, 4:5]
    return probs, score1, score2


# ----------------------------------------------------------------------------- params / reference
def init_params(key, D):
    ks = jax.random.split(key, 10)
    return {
        "wr":  0.02 * jax.random.normal(ks[0], (1, D), jnp.float32),
        "br":  jnp.zeros((1, 1), jnp.float32),
        "fw1": 0.5 * jax.random.normal(ks[1], (1, 16), jnp.float32),
        "fb1": 0.1 * jax.random.normal(ks[2], (1, 16), jnp.float32),
        "fw2": 0.5 * jax.random.normal(ks[3], (1, 16), jnp.float32),
        "fb2": 0.1 * jax.random.normal(ks[4], (1, 1), jnp.float32),
        "gw1": 0.5 * jax.random.normal(ks[5], (1, 16), jnp.float32),
        "gb1": 0.1 * jax.random.normal(ks[6], (1, 16), jnp.float32),
        "gw2": 0.5 * jax.random.normal(ks[7], (1, 16), jnp.float32),
        "gb2": 0.1 * jax.random.normal(ks[8], (1, 1), jnp.float32),
    }


def reference_forward(image1, image2, params):
    B = image1.shape[0]
    D = 1
    for s in image1.shape[1:]:
        D *= s
    x1 = image1.reshape(B, D).astype(jnp.float32)
    x2 = image2.reshape(B, D).astype(jnp.float32)
    s1 = x1 @ params["wr"].T + params["br"]
    s2 = x2 @ params["wr"].T + params["br"]
    d = s1 - s2

    def mlp(v, w1, b1, w2, b2):
        h = jax.nn.sigmoid(v * w1 + b1)
        return jnp.sum(h * w2, axis=1, keepdims=True) + b2

    px = mlp(d, params["fw1"], params["fb1"], params["fw2"], params["fb2"])
    pnx = mlp(-d, params["fw1"], params["fb1"], params["fw2"], params["fb2"])
    gx = (mlp(d, params["gw1"], params["gb1"], params["gw2"], params["gb2"])
          + mlp(-d, params["gw1"], params["gb1"], params["gw2"], params["gb2"]))
    logits = jnp.concatenate([px, gx, pnx], axis=1)
    return jax.nn.softmax(logits, axis=1), s1, s2


def _run_case(name, key, B, C, H, W, target_block_bytes=_TARGET_BLOCK_BYTES):
    D = C * H * W
    k1, k2, k3, kp = jax.random.split(key, 4)
    image1 = jax.random.normal(k1, (B, C, H, W), jnp.float32)
    image2 = jax.random.normal(k2, (B, C, H, W), jnp.float32)
    imaget = jax.random.normal(k3, (B, C, H, W), jnp.float32)
    params = init_params(kp, D)

    probs, s1, s2 = classifier_forward(image1, image2, imaget, params,
                                       target_block_bytes=target_block_bytes)
    jax.block_until_ready((probs, s1, s2))

    r_probs, r_s1, r_s2 = reference_forward(image1, image2, params)
    assert probs.shape == (B, 3) and s1.shape == (B, 1) and s2.shape == (B, 1), name
    assert jnp.allclose(probs, r_probs, atol=1e-5, rtol=1e-4), name
    assert jnp.allclose(s1, r_s1, atol=1e-5, rtol=1e-4), name
    assert jnp.allclose(s2, r_s2, atol=1e-5, rtol=1e-4), name
    assert jnp.allclose(jnp.sum(probs, axis=1), jnp.ones((B,)), atol=1e-5), name


if __name__ == "__main__":
    key = jax.random.PRNGKey(0)
    ka, kb, kc = jax.random.split(key, 3)

    # Case A: small shapes straight from the module contract; default tiling
    # keeps the whole problem in a single grid step.
    _run_case("single_step", ka, B=2, C=4, H=16, W=32)

    # Case B: same shapes, tiny block budget -> 2 D-tiles, exercising the
    # gridded reduction (accumulator init at k==0, epilogue at k==last) and the
    # dynamic 128-aligned slice of the resident rank weight.
    _run_case("gridded_reduction", kb, B=2, C=4, H=16, W=32, target_block_bytes=8192)

    # Case C: B=16 (forces >= 2 batch tiles for v7x megacore) and D=300, which
    # is not a multiple of 128 -> exercises the zero-padding path.
    _run_case("padded_megacore", kc, B=16, C=3, H=10, W=10)

    print("KERNEL_OK")
</pallas_src>

<mosaic_0001>
module attributes {stable_mosaic.version = 11 : i64} {
  func.func @classifier_kernel(%arg0: i32, %arg1: i32, %arg2: memref<2x2048xf32, #tpu.memory_space<vmem>>, %arg3: memref<2x2048xf32, #tpu.memory_space<vmem>>, %arg4: memref<1x2048xf32, #tpu.memory_space<vmem>>, %arg5: memref<8x128xf32, #tpu.memory_space<vmem>>, %arg6: memref<2x128xf32, #tpu.memory_space<vmem>>, %arg7: memref<2x1xf32, #tpu.memory_space<vmem>>, %arg8: memref<2x1xf32, #tpu.memory_space<vmem>>) attributes {dimension_semantics = [#tpu.dimension_semantics<parallel>, #tpu.dimension_semantics<arbitrary>], iteration_bounds = array<i64: 1, 1>, scalar_prefetch = 0 : i64, scratch_operands = 2 : i64, tpu.core_type = #tpu.core_type<tc>, window_params = [{transform_indices = @transform_0, window_bounds = array<i64: 2, 2048>}, {transform_indices = @transform_1, window_bounds = array<i64: 2, 2048>}, {pipeline_mode = #tpu.pipeline_mode<synchronous>, transform_indices = @transform_2, window_bounds = array<i64: 1, 2048>}, {pipeline_mode = #tpu.pipeline_mode<synchronous>, transform_indices = @transform_3, window_bounds = array<i64: 8, 128>}, {transform_indices = @transform_4, window_bounds = array<i64: 2, 128>}]} {
    %c0_i32 = arith.constant 0 : i32
    %0 = arith.cmpi eq, %arg1, %c0_i32 : i32
    %1 = arith.extui %0 : i1 to i32
    %c0_i32_0 = arith.constant 0 : i32
    %2 = arith.cmpi ne, %1, %c0_i32_0 : i32
    scf.if %2 {
      %cst_16 = arith.constant 0.000000e+00 : f32
      %26 = vector.broadcast %cst_16 : f32 to vector<2x1xf32>
      %c0_17 = arith.constant 0 : index
      %c0_18 = arith.constant 0 : index
      %27 = vector.load %arg7[%c0_17, %c0_18] : memref<2x1xf32, #tpu.memory_space<vmem>>, vector<2x1xf32>
      tpu.vector_store %arg7[%c0_17, %c0_18], %26 {strides = array<i32>} : memref<2x1xf32, #tpu.memory_space<vmem>>, vector<2x1xf32>,
      %cst_19 = arith.constant 0.000000e+00 : f32
      %28 = vector.broadcast %cst_19 : f32 to vector<2x1xf32>
      %c0_20 = arith.constant 0 : index
      %c0_21 = arith.constant 0 : index
      %29 = vector.load %arg8[%c0_20, %c0_21] : memref<2x1xf32, #tpu.memory_space<vmem>>, vector<2x1xf32>
      tpu.vector_store %arg8[%c0_20, %c0_21], %28 {strides = array<i32>} : memref<2x1xf32, #tpu.memory_space<vmem>>, vector<2x1xf32>,
    } else {
    }
    %c2048_i32 = arith.constant 2048 : i32
    %3 = arith.muli %arg1, %c2048_i32 : i32
    %4 = tpu.assume_multiple %3, 128 : i32
    %c0 = arith.constant 0 : index
    %5 = arith.index_cast %4 : i32 to index
    %6 = vector.load %arg4[%c0, %5] : memref<1x2048xf32, #tpu.memory_space<vmem>>, vector<1x2048xf32>
    %c0_1 = arith.constant 0 : index
    %c0_2 = arith.constant 0 : index
    %7 = vector.load %arg2[%c0_1, %c0_2] : memref<2x2048xf32, #tpu.memory_space<vmem>>, vector<2x2048xf32>
    %c0_3 = arith.constant 0 : index
    %c0_4 = arith.constant 0 : index
    %8 = vector.load %arg3[%c0_3, %c0_4] : memref<2x2048xf32, #tpu.memory_space<vmem>>, vector<2x2048xf32>
    %c0_5 = arith.constant 0 : index
    %c0_6 = arith.constant 0 : index
    %9 = vector.load %arg7[%c0_5, %c0_6] : memref<2x1xf32, #tpu.memory_space<vmem>>, vector<2x1xf32>
    %10 = vector.broadcast %6 : vector<1x2048xf32> to vector<2x2048xf32>
    %11 = arith.mulf %7, %10 : vector<2x2048xf32>
    %cst = arith.constant dense<0.000000e+00> : vector<2xf32>
    %12 = vector.multi_reduction <add>, %11, %cst [1] : vector<2x2048xf32> to vector<2xf32>
    %13 = vector.shape_cast %12 : vector<2xf32> to vector<2x1xf32>
    %14 = arith.addf %9, %13 : vector<2x1xf32>
    %c0_7 = arith.constant 0 : index
    %c0_8 = arith.constant 0 : index
    %15 = vector.load %arg7[%c0_7, %c0_8] : memref<2x1xf32, #tpu.memory_space<vmem>>, vector<2x1xf32>
    tpu.vector_store %arg7[%c0_7, %c0_8], %14 {strides = array<i32>} : memref<2x1xf32, #tpu.memory_space<vmem>>, vector<2x1xf32>,
    %c0_9 = arith.constant 0 : index
    %c0_10 = arith.constant 0 : index
    %16 = vector.load %arg8[%c0_9, %c0_10] : memref<2x1xf32, #tpu.memory_space<vmem>>, vector<2x1xf32>
    %17 = vector.broadcast %6 : vector<1x2048xf32> to vector<2x2048xf32>
    %18 = arith.mulf %8, %17 : vector<2x2048xf32>
    %cst_11 = arith.constant dense<0.000000e+00> : vector<2xf32>
    %19 = vector.multi_reduction <add>, %18, %cst_11 [1] : vector<2x2048xf32> to vector<2xf32>
    %20 = vector.shape_cast %19 : vector<2xf32> to vector<2x1xf32>
    %21 = arith.addf %16, %20 : vector<2x1xf32>
    %c0_12 = arith.constant 0 : index
    %c0_13 = arith.constant 0 : index
    %22 = vector.load %arg8[%c0_12, %c0_13] : memref<2x1xf32, #tpu.memory_space<vmem>>, vector<2x1xf32>
    tpu.vector_store %arg8[%c0_12, %c0_13], %21 {strides = array<i32>} : memref<2x1xf32, #tpu.memory_space<vmem>>, vector<2x1xf32>,
    %c0_i32_14 = arith.constant 0 : i32
    %23 = arith.cmpi eq, %arg1, %c0_i32_14 : i32
    %24 = arith.extui %23 : i1 to i32
    %c0_i32_15 = arith.constant 0 : i32
    %25 = arith.cmpi ne, %24, %c0_i32_15 : i32
    scf.if %25 {
      %c0_16 = arith.constant 0 : index
      %c0_17 = arith.constant 0 : index
      %26 = vector.load %arg5[%c0_16, %c0_17] : memref<8x128xf32, #tpu.memory_space<vmem>>, vector<8x128xf32>
      %27 = vector.extract_strided_slice %26 {offsets = [0, 0], sizes = [1, 64], strides = [1, 1]} : vector<8x128xf32> to vector<1x64xf32>
      %28 = vector.extract_strided_slice %26 {offsets = [1, 0], sizes = [1, 64], strides = [1, 1]} : vector<8x128xf32> to vector<1x64xf32>
      %29 = vector.extract_strided_slice %26 {offsets = [2, 0], sizes = [1, 64], strides = [1, 1]} : vector<8x128xf32> to vector<1x64xf32>
      %30 = vector.extract_strided_slice %26 {offsets = [3, 0], sizes = [1, 1], strides = [1, 1]} : vector<8x128xf32> to vector<1x1xf32>
      %31 = vector.extract_strided_slice %26 {offsets = [3, 1], sizes = [1, 1], strides = [1, 1]} : vector<8x128xf32> to vector<1x1xf32>
      %32 = vector.extract_strided_slice %26 {offsets = [3, 2], sizes = [1, 1], strides = [1, 1]} : vector<8x128xf32> to vector<1x1xf32>
      %c0_18 = arith.constant 0 : index
      %c0_19 = arith.constant 0 : index
      %33 = vector.load %arg7[%c0_18, %c0_19] : memref<2x1xf32, #tpu.memory_space<vmem>>, vector<2x1xf32>
      %34 = vector.broadcast %32 : vector<1x1xf32> to vector<2x1xf32>
      %35 = arith.addf %33, %34 : vector<2x1xf32>
      %c0_20 = arith.constant 0 : index
      %c0_21 = arith.constant 0 : index
      %36 = vector.load %arg8[%c0_20, %c0_21] : memref<2x1xf32, #tpu.memory_space<vmem>>, vector<2x1xf32>
      %37 = vector.broadcast %32 : vector<1x1xf32> to vector<2x1xf32>
      %38 = arith.addf %36, %37 : vector<2x1xf32>
      %39 = arith.subf %35, %38 : vector<2x1xf32>
      %40 = vector.broadcast %39 : vector<2x1xf32> to vector<2x64xf32>
      %41 = vector.broadcast %27 : vector<1x64xf32> to vector<2x64xf32>
      %42 = arith.mulf %40, %41 : vector<2x64xf32>
      %43 = vector.broadcast %28 : vector<1x64xf32> to vector<2x64xf32>
      %44 = arith.addf %42, %43 : vector<2x64xf32>
      %45 = arith.negf %44 : vector<2x64xf32>
      %46 = math.exp %45 : vector<2x64xf32>
      %cst_22 = arith.constant 1.000000e+00 : f32
      %47 = vector.broadcast %cst_22 : f32 to vector<2x64xf32>
      %48 = arith.addf %47, %46 : vector<2x64xf32>
      %49 = arith.divf %47, %48 : vector<2x64xf32>
      %50 = vector.broadcast %29 : vector<1x64xf32> to vector<2x64xf32>
      %51 = arith.mulf %49, %50 : vector<2x64xf32>
      %52 = vector.extract_strided_slice %51 {offsets = [0, 0], sizes = [2, 16], strides = [1, 1]} : vector<2x64xf32> to vector<2x16xf32>
      %cst_23 = arith.constant dense<0.000000e+00> : vector<2xf32>
      %53 = vector.multi_reduction <add>, %52, %cst_23 [1] : vector<2x16xf32> to vector<2xf32>
      %54 = vector.shape_cast %53 : vector<2xf32> to vector<2x1xf32>
      %55 = vector.broadcast %30 : vector<1x1xf32> to vector<2x1xf32>
      %56 = arith.addf %54, %55 : vector<2x1xf32>
      %57 = vector.extract_strided_slice %51 {offsets = [0, 16], sizes = [2, 16], strides = [1, 1]} : vector<2x64xf32> to vector<2x16xf32>
      %cst_24 = arith.constant dense<0.000000e+00> : vector<2xf32>
      %58 = vector.multi_reduction <add>, %57, %cst_24 [1] : vector<2x16xf32> to vector<2xf32>
      %59 = vector.shape_cast %58 : vector<2xf32> to vector<2x1xf32>
      %60 = vector.broadcast %30 : vector<1x1xf32> to vector<2x1xf32>
      %61 = arith.addf %59, %60 : vector<2x1xf32>
      %62 = vector.extract_strided_slice %51 {offsets = [0, 32], sizes = [2, 32], strides = [1, 1]} : vector<2x64xf32> to vector<2x32xf32>
      %cst_25 = arith.constant dense<0.000000e+00> : vector<2xf32>
      %63 = vector.multi_reduction <add>, %62, %cst_25 [1] : vector<2x32xf32> to vector<2xf32>
      %64 = vector.shape_cast %63 : vector<2xf32> to vector<2x1xf32>
      %cst_26 = arith.constant 2.000000e+00 : f32
      %65 = vector.broadcast %cst_26 : f32 to vector<1x1xf32>
      %66 = arith.mulf %65, %31 : vector<1x1xf32>
      %67 = vector.broadcast %66 : vector<1x1xf32> to vector<2x1xf32>
      %68 = arith.addf %64, %67 : vector<2x1xf32>
      %69 = tpu.concatenate %56, %68, %61 in 1 : vector<2x1xf32>, vector<2x1xf32>, vector<2x1xf32> -> vector<2x3xf32>
      %cst_27 = arith.constant dense<0xFF800000> : vector<2xf32>
      %70 = vector.multi_reduction <maximumf>, %69, %cst_27 [1] : vector<2x3xf32> to vector<2xf32>
      %71 = vector.shape_cast %70 : vector<2xf32> to vector<2x1xf32>
      %72 = vector.broadcast %71 : vector<2x1xf32> to vector<2x3xf32>
      %73 = arith.subf %69, %72 : vector<2x3xf32>
      %74 = math.exp %73 : vector<2x3xf32>
      %cst_28 = arith.constant dense<0.000000e+00> : vector<2xf32>
      %75 = vector.multi_reduction <add>, %74, %cst_28 [1] : vector<2x3xf32> to vector<2xf32>
      %76 = vector.shape_cast %75 : vector<2xf32> to vector<2x1xf32>
      %77 = vector.broadcast %76 : vector<2x1xf32> to vector<2x3xf32>
      %78 = arith.divf %74, %77 : vector<2x3xf32>
      %cst_29 = arith.constant 0.000000e+00 : f32
      %79 = vector.broadcast %cst_29 : f32 to vector<2x123xf32>
      %80 = tpu.concatenate %78, %35, %38, %79 in 1 : vector<2x3xf32>, vector<2x1xf32>, vector<2x1xf32>, vector<2x123xf32> -> vector<2x128xf32>
      %c0_30 = arith.constant 0 : index
      %c0_31 = arith.constant 0 : index
      %81 = vector.load %arg6[%c0_30, %c0_31] : memref<2x128xf32, #tpu.memory_space<vmem>>, vector<2x128xf32>
      tpu.vector_store %arg6[%c0_30, %c0_31], %80 {strides = array<i32>} : memref<2x128xf32, #tpu.memory_space<vmem>>, vector<2x128xf32>,
    } else {
    }
    return
  }
  func.func @transform_0(%arg0: i32, %arg1: i32) -> (i32, i32) {
    %c0_i32 = arith.constant 0 : i32
    return %arg0, %arg1 : i32, i32
  }
  func.func @transform_1(%arg0: i32, %arg1: i32) -> (i32, i32) {
    %c0_i32 = arith.constant 0 : i32
    return %arg0, %arg1 : i32, i32
  }
  func.func @transform_2(%arg0: i32, %arg1: i32) -> (i32, i32) {
    %c0_i32 = arith.constant 0 : i32
    %c0_i32_0 = arith.constant 0 : i32
    %c0_i32_1 = arith.constant 0 : i32
    return %c0_i32, %c0_i32_0 : i32, i32
  }
  func.func @transform_3(%arg0: i32, %arg1: i32) -> (i32, i32) {
    %c0_i32 = arith.constant 0 : i32
    %c0_i32_0 = arith.constant 0 : i32
    %c0_i32_1 = arith.constant 0 : i32
    return %c0_i32, %c0_i32_0 : i32, i32
  }
  func.func @transform_4(%arg0: i32, %arg1: i32) -> (i32, i32) {
    %c0_i32 = arith.constant 0 : i32
    %c0_i32_0 = arith.constant 0 : i32
    return %arg0, %c0_i32 : i32, i32
  }
}

</mosaic_0001>

<bundles_post_ra>
// kernel: tpu_custom_call.1
= control target key start
LH: loop header
LB: loop body
LE: loop exit
PB: predicated region body
PF: predicated region fallthrough
CT: control target
= control target key end

     0   :  { %9 = vsyncpa [#allocation5], 0  ;;  %s893_s0 = inlined_call_operand.hbm [shape: f32[2,2048], index: 0, kind: input, shape index: {}]   ;;  %s894_s1 = inlined_call_operand.hbm [shape: f32[2,2048], index: 1, kind: input, shape index: {}]   ;;  %s895_s2 = inlined_call_operand.hbm [shape: f32[1,2048], index: 2, kind: input, shape index: {}]   ;;  %s896_s3 = inlined_call_operand.vmem [shape: f32[8,128], index: 3, kind: input, shape index: {}]   ;;  %s897_s4 = inlined_call_operand.hbm [shape: f32[2,128], index: 4, kind: output, shape index: {}]  }
   0x1   :  { %10 = vsyncpa [#allocation8], 0 }
   0x2   :  { %11 = vsyncpa [#allocation6], 0  ;;  %s709_s15 = smov [#allocation7]   ;;  %s710_s17 = smov [#allocation4]  }
   0x3   :  { %s28_s16 = sshll.u32 %s709_s15, 4  ;;  %s18_s18 = sshll.u32 %s710_s17, 4  ;;  %s29_s16 = int_to_ptr.vmem [resolvable:$true] %s28_s16  ;;  %s19_s18 = int_to_ptr.vmem [resolvable:$true] %s18_s18 }
   0x4   :  { %s615_s21 = scalar_lea.hbm %s894_s1, 512 }
   0x5   :  { %p616_p0 = scmp.ne.s32.totalorder %s894_s1, %s615_s21  ;;  %p619_p1 = scmp.lt.u32.totalorder %s615_s21, %s894_s1 }
   0x7   :  { %p621_p2 = pnand %p619_p1, %p616_p0 }
   0x9   :  { %624 = shalt.err (!%p621_p2)
}
   0xa   :  { %s625_s26 = scalar_lea.vmem %s29_s16, 512  ;;  %p630_p4 = scmp.lt.s32.totalorder %s29_s16, %s29_s16 }
   0xb   :  { %p626_p3 = scmp.ne.s32.totalorder %s29_s16, %s625_s26  ;;  %p631_p5 = scmp.lt.s32.totalorder %s625_s26, %s625_s26 }
   0xd   :  { %p632_p6 = por %p631_p5, %p630_p4 }
   0xf   :  { %p633_p7 = pnand %p632_p6, %p626_p3 }
  0x11   :  { %636 = shalt.err (!%p633_p7)
}
  0x12   :  { %31 = dma.hbm_to_vmem [thread:$0]  %s894_s1, 512, %s29_s16, [#allocation8]  }
  0x13   :  { %s637_s5 = scalar_lea.hbm %s893_s0, 512 }
  0x14   :  { %p638_p8 = scmp.ne.s32.totalorder %s893_s0, %s637_s5  ;;  %p641_p9 = scmp.lt.u32.totalorder %s637_s5, %s893_s0 }
  0x16   :  { %p643_p10 = pnand %p641_p9, %p638_p8 }
  0x18   :  { %646 = shalt.err (!%p643_p10)
}
  0x19   :  { %s647_s10 = scalar_lea.vmem %s19_s18, 512  ;;  %p652_p12 = scmp.lt.s32.totalorder %s19_s18, %s19_s18 }
  0x1a   :  { %p648_p11 = scmp.ne.s32.totalorder %s19_s18, %s647_s10  ;;  %p653_p13 = scmp.lt.s32.totalorder %s647_s10, %s647_s10 }
  0x1c   :  { %p654_p0 = por %p653_p13, %p652_p12 }
  0x1e   :  { %p655_p1 = pnand %p654_p0, %p648_p11 }
  0x20   :  { %658 = shalt.err (!%p655_p1)
}
  0x21   :  { %21 = dma.hbm_to_vmem [thread:$0]  %s893_s0, 512, %s19_s18, [#allocation5]  }
  0x22   :  { %s711_s12 = smov [#allocation9]   ;;  %s659_s16 = scalar_lea.hbm %s895_s2, 256 }
  0x23   :  { %s38_s13 = sshll.u32 %s711_s12, 4  ;;  %p660_p2 = scmp.ne.s32.totalorder %s895_s2, %s659_s16  ;;  %s39_s13 = int_to_ptr.vmem [resolvable:$true] %s38_s13 }
  0x24   :  { %p663_p3 = scmp.lt.u32.totalorder %s659_s16, %s895_s2 }
  0x26   :  { %p665_p4 = pnand %p663_p3, %p660_p2 }
  0x28   :  { %668 = shalt.err (!%p665_p4)
}
  0x29   :  { %s669_s22 = scalar_lea.vmem %s39_s13, 256  ;;  %p674_p6 = scmp.lt.s32.totalorder %s39_s13, %s39_s13 }
  0x2a   :  { %p670_p5 = scmp.ne.s32.totalorder %s39_s13, %s669_s22  ;;  %p675_p7 = scmp.lt.s32.totalorder %s669_s22, %s669_s22 }
  0x2c   :  { %p676_p8 = por %p675_p7, %p674_p6 }
  0x2e   :  { %p677_p9 = pnand %p676_p8, %p670_p5 }
  0x30   :  { %680 = shalt.err (!%p677_p9)
}
  0x31   :  { %41 = dma.hbm_to_vmem [thread:$0]  %s895_s2, 256, %s39_s13, [#allocation8]  }
  0x32   :  { %703 = dma.done.wait [#allocation5], 512  }
  0x33   :  { %704 = vsyncadd [#allocation5], 4294966784 }
  0x34   :  { %705 = dma.done.wait [#allocation8], 768  }
  0x35   :  { %706 = vsyncadd [#allocation8], 4294966528  ;;  %v77_v0 = vlaneseq  ;;  %v712_v1 = vmov 1983009808   ;;  %vm57_vm0 = vcmask 1024   ;;  %v713_v4 = vmov 0.0  }
  0x36   :  { %v144_v2 = vunpack.c.l.s4 %v712_v1  ;;  %58 = vst.msk [vmem:[#allocation2] sm:$0x3] %vm57_vm0, %v713_v4  ;;  %59 = vst.msk [vmem:[#allocation3] sm:$0x3] %vm57_vm0, %v713_v4  ;;  %v64_v14 = vld [vmem:[#allocation9] sm:$0xff]  ;;  %v65_v15 = vld [vmem:[#allocation9 + $0x8] sm:$0xff] }
  0x37   :  { %v78_v3 = vshrl.u32 %v77_v0, 7  ;;  %v806_v35 = vld [vmem:[%s896_s3] sm:$0xff]  ;;  %v67_v41 = vld [vmem:[#allocation4 + $0x8] sm:$0xff]  ;;  %s714_s3 = smov 126   ;;  %vm305_vm1 = vcmask 1041408   ;;  %v68_v63 = vld [vmem:[#allocation4 + $0x10] sm:$0xff] }
  0x38   :  { %v145_v5 = vunpack.c.0.s8 %v144_v2  ;;  %v66_v40 = vld [vmem:[#allocation4] sm:$0xff]  ;;  %s716_s24 = smov 96   ;;  %s717_s25 = smov 112   ;;  %vm513_vm2 = vcmask 123904   ;;  %vm529_vm3 = vcmask 254976   ;;  %vm543_vm4 = vcmask 7168  }
  0x39   :  { %v785_v6 = vsub.s32 0, %v78_v3  ;;  %v787_v7 = vsub.s32 1, %v78_v3  ;;  %v789_v8 = vsub.s32 2, %v78_v3  ;;  %v791_v9 = vsub.s32 3, %v78_v3  ;;  %v70_v62 = vld [vmem:[#allocation7] sm:$0xff]  ;;  %s718_s26 = smov 2  }
  0x3a   :  { %v95_v10 = vsub.s32 4, %v78_v3  ;;  %v99_v11 = vsub.s32 5, %v78_v3  ;;  %v103_v12 = vsub.s32 6, %v78_v3  ;;  %v107_v13 = vsub.s32 7, %v78_v3  ;;  %s719_s27 = smov 4   ;;  %s720_s28 = smov 3  }
  0x3b   :  { %v793_v16 = vsub.s32 %v145_v5, %v78_v3  ;;  %v80_v17 = vrot.slane %v64_v14, %v785_v6  ;;  %v84_v18 = vrot.slane %v64_v14, %v787_v7  ;;  %v88_v19 = vrot.slane %v64_v14, %v789_v8  ;;  %s721_s29 = smov [#allocation10]  }
  0x3c   :  { %v92_v20 = vrot.slane %v64_v14, %v791_v9  ;;  %v96_v21 = vrot.slane %v64_v14, %v95_v10  ;;  %v100_v22 = vrot.slane %v64_v14, %v99_v11  ;;  %v104_v23 = vrot.slane %v64_v14, %v103_v12  ;;  %s580_s30 = sshll.u32 %s721_s29, 4  ;;  %s581_s30 = int_to_ptr.vmem [resolvable:$true] %s580_s30 }
  0x3d   :  { %v108_v24 = vrot.slane %v64_v14, %v107_v13  ;;  %v112_v25 = vrot.slane %v65_v15, %v785_v6  ;;  %v116_v26 = vrot.slane %v65_v15, %v787_v7  ;;  %v120_v27 = vrot.slane %v65_v15, %v789_v8  ;;  %s681_s5 = scalar_lea.vmem %s581_s30, 32  ;;  %p686_p11 = scmp.lt.s32.totalorder %s581_s30, %s581_s30 }
  0x3e   :  { %v124_v28 = vrot.slane %v65_v15, %v791_v9  ;;  %v141_v29 = vcombine.low %v80_v17, %v84_v18  ;;  %v142_v30 = vcombine.low %v88_v19, %v92_v20  ;;  %v158_v31 = vcombine.low %v96_v21, %v100_v22  ;;  %v71_v17 = vld [vmem:[#allocation7 + $0x8] sm:$0xff]  ;;  %v69_v21 = vld [vmem:[#allocation4 + $0x18] sm:$0xff]  ;;  %p682_p10 = scmp.ne.s32.totalorder %s581_s30, %s681_s5  ;;  %p687_p12 = scmp.lt.s32.totalorder %s681_s5, %s681_s5 }
  0x3f   :  { %v159_v32 = vcombine.low %v104_v23, %v108_v24  ;;  %v175_v33 = vcombine.low %v112_v25, %v116_v26  ;;  %v128_v42 = vrot.slane %v65_v15, %v95_v10  ;;  %v132_v43 = vrot.slane %v65_v15, %v99_v11 }
  0x40   :  { %v176_v34 = vcombine.low %v120_v27, %v124_v28  ;;  %v149_v36 = vrot.slane %v141_v29, %v793_v16  ;;  %v156_v37 = vrot.slane %v142_v30, %v793_v16  ;;  %v166_v38 = vrot.slane %v158_v31, %v793_v16  ;;  %p688_p13 = por %p687_p12, %p686_p11 }
  0x41   :  { %v173_v39 = vrot.slane %v159_v32, %v793_v16  ;;  %v136_v44 = vrot.slane %v65_v15, %v103_v12  ;;  %v140_v45 = vrot.slane %v65_v15, %v107_v13  ;;  %v814_v48 = vrot.slane %v806_v35, %v791_v9 }
  0x42   :  { %v157_v46 = vcombine.low %v149_v36, %v156_v37  ;;  %v183_v49 = vrot.slane %v175_v33, %v793_v16  ;;  %v190_v50 = vrot.slane %v176_v34, %v793_v16  ;;  %v192_v53 = vcombine.low %v128_v42, %v132_v43  ;;  %v72_v37 = vld [vmem:[#allocation7 + $0x10] sm:$0xff]  ;;  %p689_p0 = pnand %p688_p13, %p682_p10 }
  0x43   :  { %v174_v47 = vcombine.low %v166_v38, %v173_v39  ;;  %480 = vrot.lane.b32.xlu1 %v814_v48, %s714_s3  ;;  %v193_v54 = vcombine.low %v136_v44, %v140_v45  ;;  %vm545_vm5 = vcmask 15360   ;;  %vm547_vm6 = vcmask 17408  }
  0x44   :  { %v213_v51 = vmul.f32 %v157_v46, %v66_v40  ;;  %v191_v57 = vcombine.low %v183_v49, %v190_v50  ;;  %v200_v0 = vrot.slane %v192_v53, %v793_v16  ;;  %v343_v11 = vmul.f32 %v157_v46, %v70_v62 }
  0x45   :  { %v214_v52 = vmul.f32 %v174_v47, %v67_v41  ;;  %v207_v1 = vrot.slane %v193_v54, %v793_v16  ;;  %v344_v24 = vmul.f32 %v174_v47, %v71_v17  ;;  %vm567_vm7 = vcmask 23552  }
  0x46   :  { %v221_v55 = vcombine.high %v213_v51, %v213_v51  ;;  %v228_v56 = vrot.slane %v213_v51, %v793_v16  ;;  %v215_v12 = vmul.f32 %v191_v57, %v68_v63  ;;  %v351_v25 = vcombine.high %v343_v11, %v343_v11 }
  0x47   :  { %v238_v60 = vcombine.high %v214_v52, %v214_v52  ;;  %v245_v61 = vrot.slane %v214_v52, %v793_v16  ;;  %v208_v19 = vcombine.low %v200_v0, %v207_v1  ;;  %v358_v29 = vrot.slane %v343_v11, %v793_v16 }
  0x48   :  { %v235_v58 = vrot.slane %v221_v55, %v793_v16  ;;  %v236_v59 = vcombine.high %v228_v56, %v228_v56  ;;  %v306_v3 = vsel %vm305_vm1, %v228_v56, 0.0  ;;  %v255_v22 = vcombine.high %v215_v12, %v215_v12 }
  0x49   :  { %v252_v13 = vrot.slane %v238_v60, %v793_v16  ;;  %v253_v14 = vcombine.high %v245_v61, %v245_v61  ;;  %v313_v20 = vsel %vm305_vm1, %v245_v61, 0.0  ;;  %v262_v27 = vrot.slane %v215_v12, %v793_v16 }
  0x4a   :  { %v237_v2 = vcombine.high %v235_v58, %v235_v58  ;;  %v307_v4 = vsel %vm305_vm1, %v236_v59, 0.0  ;;  %v309_v10 = vsel %vm305_vm1, %v235_v58, 0.0  ;;  %v365_v31 = vrot.slane %v351_v25, %v793_v16 }
  0x4b   :  { %v308_v5 = vadd.f32 %v307_v4, %v306_v3  ;;  %v254_v26 = vcombine.high %v252_v13, %v252_v13  ;;  %v315_v28 = vsel %vm305_vm1, %v253_v14, 0.0  ;;  %v216_v32 = vmul.f32 %v208_v19, %v69_v21  ;;  %v73_v3 = vld [vmem:[#allocation7 + $0x18] sm:$0xff] }
  0x4c   :  { %v311_v15 = vsel %vm305_vm1, %v237_v2, 0.0  ;;  %v317_v33 = vsel %vm305_vm1, %v252_v13, 0.0  ;;  %v366_v34 = vcombine.high %v358_v29, %v358_v29  ;;  %v367_v38 = vcombine.high %v365_v31, %v365_v31 }
  0x4d   :  { %v310_v18 = vadd.f32 %v309_v10, %v308_v5  ;;  %v368_v39 = vcombine.high %v344_v24, %v344_v24  ;;  %v375_v40 = vrot.slane %v344_v24, %v793_v16  ;;  %v269_v41 = vrot.slane %v255_v22, %v793_v16 }
  0x4e   :  { %v270_v42 = vcombine.high %v262_v27, %v262_v27  ;;  %v319_v43 = vsel %vm305_vm1, %v254_v26, 0.0  ;;  %v435_v44 = vsel %vm305_vm1, %v358_v29, 0.0  ;;  %v436_v46 = vsel %vm305_vm1, %v366_v34, 0.0 }
  0x4f   :  { %v312_v23 = vadd.f32 %v311_v15, %v310_v18  ;;  %v438_v47 = vsel %vm305_vm1, %v365_v31, 0.0  ;;  %v272_v49 = vcombine.high %v216_v32, %v216_v32  ;;  %v321_v50 = vsel %vm305_vm1, %v262_v27, 0.0 }
  0x50   :  { %v345_v51 = vmul.f32 %v191_v57, %v72_v37  ;;  %v437_v52 = vadd.f32 %v436_v46, %v435_v44  ;;  %v382_v54 = vrot.slane %v368_v39, %v793_v16  ;;  %v383_v55 = vcombine.high %v375_v40, %v375_v40 }
  0x51   :  { %v314_v30 = vadd.f32 %v313_v20, %v312_v23  ;;  %v440_v56 = vsel %vm305_vm1, %v367_v38, 0.0  ;;  %v271_v58 = vcombine.high %v269_v41, %v269_v41  ;;  %v279_v59 = vrot.slane %v216_v32, %v793_v16 }
  0x52   :  { %v323_v60 = vsel %vm305_vm1, %v270_v42, 0.0  ;;  %v439_v61 = vadd.f32 %v438_v47, %v437_v52  ;;  %v442_v63 = vsel %vm305_vm1, %v375_v40, 0.0  ;;  %v325_v0 = vsel %vm305_vm1, %v269_v41, 0.0 }
  0x53   :  { %v316_v36 = vadd.f32 %v315_v28, %v314_v30  ;;  %v385_v1 = vcombine.high %v345_v51, %v345_v51  ;;  %v384_v4 = vcombine.high %v382_v54, %v382_v54  ;;  %v392_v5 = vrot.slane %v345_v51, %v793_v16 }
  0x54   :  { %v441_v57 = vadd.f32 %v440_v56, %v439_v61  ;;  %v444_v10 = vsel %vm305_vm1, %v383_v55, 0.0  ;;  %v286_v11 = vrot.slane %v272_v49, %v793_v16  ;;  %v287_v12 = vcombine.high %v279_v59, %v279_v59 }
  0x55   :  { %v318_v45 = vadd.f32 %v317_v33, %v316_v36  ;;  %v327_v13 = vsel %vm305_vm1, %v271_v58, 0.0  ;;  %v446_v17 = vsel %vm305_vm1, %v382_v54, 0.0  ;;  %v329_v18 = vsel %vm305_vm1, %v279_v59, 0.0 }
  0x56   :  { %v443_v14 = vadd.f32 %v442_v63, %v441_v57  ;;  %v346_v20 = vmul.f32 %v208_v19, %v73_v3  ;;  %v399_v23 = vrot.slane %v385_v1, %v793_v16  ;;  %v400_v24 = vcombine.high %v392_v5, %v392_v5  ;;  %v342_v63 = vld [vmem:[#allocation3] sm:$0x3] }
  0x57   :  { %v320_v53 = vadd.f32 %v319_v43, %v318_v45  ;;  %v448_v25 = vsel %vm305_vm1, %v384_v4, 0.0  ;;  %v288_v26 = vcombine.high %v286_v11, %v286_v11  ;;  %v331_v27 = vsel %vm305_vm1, %v287_v12, 0.0 }
  0x58   :  { %v445_v21 = vadd.f32 %v444_v10, %v443_v14  ;;  %v450_v30 = vsel %vm305_vm1, %v392_v5, 0.0  ;;  %v333_v31 = vsel %vm305_vm1, %v286_v11, 0.0  ;;  %v402_v32 = vcombine.high %v346_v20, %v346_v20 }
  0x59   :  { %v322_v62 = vadd.f32 %v321_v50, %v320_v53  ;;  %v401_v19 = vcombine.high %v399_v23, %v399_v23  ;;  %v409_v36 = vrot.slane %v346_v20, %v793_v16  ;;  %v452_v37 = vsel %vm305_vm1, %v400_v24, 0.0 }
  0x5a   :  { %v447_v28 = vadd.f32 %v446_v17, %v445_v21  ;;  %v335_v38 = vsel %vm305_vm1, %v288_v26, 0.0  ;;  %v454_v41 = vsel %vm305_vm1, %v399_v23, 0.0  ;;  %v416_v44 = vrot.slane %v402_v32, %v793_v16 }
  0x5b   :  { %v324_v2 = vadd.f32 %v323_v60, %v322_v62  ;;  %v417_v45 = vcombine.high %v409_v36, %v409_v36  ;;  %v456_v46 = vsel %vm305_vm1, %v401_v19, 0.0  ;;  %v458_v49 = vsel %vm305_vm1, %v409_v36, 0.0  ;;  %v74_v60 = vld [vmem:[#allocation2] sm:$0x3] }
  0x5c   :  { %v449_v33 = vadd.f32 %v448_v25, %v447_v28  ;;  %v418_v51 = vcombine.high %v416_v44, %v416_v44  ;;  %v462_v54 = vsel %vm305_vm1, %v416_v44, 0.0  ;;  %v715_v16 = vmov 0  }
  0x5d   :  { %v326_v15 = vadd.f32 %v325_v0, %v324_v2  ;;  %v460_v52 = vsel %vm305_vm1, %v417_v45, 0.0  ;;  %605 = vset.pattern.permute.xlu1 %v715_v16  ;;  %606 = vset.pattern.permute.xlu0 %v715_v16  ;;  %v495_v11 = vrot.slane %v806_v35, %v785_v6  ;;  %v500_v12 = vrot.slane %v806_v35, %v787_v7 }
  0x5e   :  { %v451_v39 = vadd.f32 %v450_v30, %v449_v33  ;;  %v464_v56 = vsel %vm305_vm1, %v418_v51, 0.0  ;;  %v511_v21 = vrot.slane %v806_v35, %v789_v8  ;;  %v533_v8 = vmul.f32 2.0, %v806_v35 }
  0x5f   :  { %v328_v22 = vadd.f32 %v327_v13, %v326_v15  ;;  %vm569_vm8 = vcmask 31744   ;;  %vm571_vm9 = vcmask 39936  }
  0x60   :  { %v453_v42 = vadd.f32 %v452_v37, %v451_v39 }
  0x61   :  { %v330_v29 = vadd.f32 %v329_v18, %v328_v22 }
  0x62   :  { %v455_v47 = vadd.f32 %v454_v41, %v453_v42 }
  0x63   :  { %v332_v34 = vadd.f32 %v331_v27, %v330_v29  ;;  %v537_v29 = vrot.slane %v533_v8, %v791_v9 }
  0x64   :  { %v457_v50 = vadd.f32 %v456_v46, %v455_v47 }
  0x65   :  { %v334_v40 = vadd.f32 %v333_v31, %v332_v34 }
  0x66   :  { %v459_v53 = vadd.f32 %v458_v49, %v457_v50 }
  0x67   :  { %v336_v43 = vadd.f32 %v335_v38, %v334_v40 }
  0x68   :  { %v461_v55 = vadd.f32 %v460_v52, %v459_v53 }
  0x69   :  { %337 = vadd.xlane.f32.xlu0 %v336_v43 }
  0x6a   :  { %v463_v58 = vadd.f32 %v462_v54, %v461_v55 }
  0x6c   :  { %v465_v59 = vadd.f32 %v464_v56, %v463_v58 }
  0x6e   :  { %466 = vadd.xlane.f32.xlu0 %v465_v59 }
  0xb5   :  { %v481_v57 = vpop.permute.xlu1 %480 }
  0xf6   :  { %v338_v61 = vpop.xlane.xlu0 %337 }
  0xf7   :  { %v339_v62 = vadd.f32 %v338_v61, %v74_v60 }
  0xf9   :  { %341 = vst.msk [vmem:[#allocation2] sm:$0x3] %vm57_vm0, %v339_v62 }
  0xfb   :  { %v467_v0 = vpop.xlane.xlu0 %466 }
  0xfc   :  { %v468_v1 = vadd.f32 %v467_v0, %v342_v63 }
  0xfe   :  { %469 = vst.msk [vmem:[#allocation3] sm:$0x3] %vm57_vm0, %v468_v1 }
 0x100   :  { %v474_v2 = vld [vmem:[#allocation2] sm:$0x3] }
 0x101   :  { %v483_v4 = vadd.f32 %v481_v57, %v474_v2 }
 0x105   :  { %v484_v3 = vld [vmem:[#allocation3] sm:$0x3] }
 0x106   :  { %v485_v5 = vadd.f32 %v484_v3, %v481_v57 }
 0x108   :  { %v486_v10 = vsub.f32 %v483_v4, %v485_v5 }
 0x10a   :  { %489 = vperm.xlu1 %605, %v486_v10  }
 0x189   :  { %v490_v13 = vpop.permute.xlu1 %489 }
 0x18a   :  { %v496_v14 = vmul.f32 %v495_v11, %v490_v13 }
 0x18c   :  { %v501_v15 = vadd.f32 %v500_v12, %v496_v14 }
 0x18e   :  { %v591_v17 = vmul.f32 -1.442695, %v501_v15 }
 0x190   :  { %607 = vpow2.f32 %v591_v17 }
 0x19a   :  { %v608_v18 = vpop.eup %607 }
 0x19b   :  { %v505_v20 = vadd.f32 1.0, %v608_v18 }
 0x19d   :  { %609 = vrcp.f32 %v505_v20 }
 0x1a7   :  { %v610_v22 = vpop.eup %609 }
 0x1a8   :  { %v512_v23 = vmul.f32 %v610_v22, %v511_v21 }
 0x1aa   :  { %526 = vrot.lane.b32.xlu1 %v512_v23, %s716_s24  ;;  %519 = vrot.lane.b32.xlu0 %v512_v23, %s717_s25  ;;  %v514_v6 = vsel %vm513_vm2, %v512_v23, 0.0 }
 0x1c9   :  { %515 = vadd.xlane.f32.xlu0 %v514_v6 }
 0x21c   :  { %v520_v7 = vpop.permute.xlu0 %519  ;;  %v527_v25 = vpop.permute.xlu1 %526 }
 0x21d   :  { %v522_v24 = vsel %vm513_vm2, %v520_v7, 0.0  ;;  %v530_v26 = vsel %vm529_vm3, %v527_v25, 0.0 }
 0x21e   :  { %523 = vadd.xlane.f32.xlu1 %v522_v24 }
 0x222   :  { %531 = vadd.xlane.f32.xlu1 %v530_v26 }
 0x256   :  { %v516_v31 = vpop.xlane.xlu0 %515 }
 0x257   :  { %v517_v33 = vadd.f32 %v516_v31, %v814_v48 }
 0x2ab   :  { %v524_v27 = vpop.xlane.xlu1 %523 }
 0x2ac   :  { %v525_v28 = vadd.f32 %v524_v27, %v814_v48 }
 0x2ae   :  { %540 = vrot.lane.b32.xlu1 %v525_v28, %s718_s26 }
 0x2af   :  { %v532_v30 = vpop.xlane.xlu1 %531 }
 0x2b0   :  { %v538_v32 = vadd.f32 %v537_v29, %v532_v30 }
 0x2b2   :  { %564 = vrot.lane.b32.xlu1 %v485_v5, %s719_s27  ;;  %v544_v19 = vsel %vm543_vm4, %v517_v33, %v538_v32 }
 0x320   :  { %v541_v34 = vpop.permute.xlu1 %540 }
 0x321   :  { %v546_v36 = vsel %vm545_vm5, %v544_v19, %v541_v34 }
 0x322   :  { %v548_v37 = vsel %vm547_vm6, %v546_v36, -inf }
 0x323   :  { %549 = vmax.xlane.f32.xlu0 %v548_v37 }
 0x324   :  { %v565_v44 = vpop.permute.xlu1 %564 }
 0x3b0   :  { %v550_v38 = vpop.xlane.xlu0 %549 }
 0x3b1   :  { %v551_v39 = vsub.f32 %v546_v36, %v550_v38 }
 0x3b3   :  { %v552_v40 = vmul.f32 1.442695, %v551_v39 }
 0x3b5   :  { %611 = vpow2.f32 %v552_v40 }
 0x3bf   :  { %v612_v35 = vpop.eup %611 }
 0x3c0   :  { %v554_v41 = vsel %vm547_vm6, %v612_v35, 0.0 }
 0x3c1   :  { %555 = vadd.xlane.f32.xlu0 %v554_v41 }
 0x3d7   :  { %560 = vrot.lane.b32.xlu0 %v483_v4, %s720_s28 }
 0x44e   :  { %v556_v9 = vpop.xlane.xlu0 %555 }
 0x44f   :  { %613 = vrcp.f32 %v556_v9 }
 0x452   :  { %v561_v43 = vpop.permute.xlu0 %560 }
 0x459   :  { %v614_v42 = vpop.eup %613 }
 0x45a   :  { %v558_v48 = vmul.f32 %v614_v42, %v612_v35 }
 0x45c   :  { %v568_v45 = vsel %vm567_vm7, %v558_v48, %v561_v43 }
 0x45d   :  { %v570_v46 = vsel %vm569_vm8, %v568_v45, %v565_v44 }
 0x45e   :  { %v572_v47 = vsel %vm571_vm9, %v570_v46, 0.0 }
 0x45f   :  { %573 = vst [vmem:[#allocation10] sm:$0x3] %v572_v47 }
 0x460   :  { %692 = shalt.err (!%p689_p0)
}
 0x461   :  { %s693_s8 = scalar_lea.hbm %s897_s4, 32 }
 0x462   :  { %p694_p1 = scmp.ne.s32.totalorder %s897_s4, %s693_s8  ;;  %p697_p2 = scmp.lt.u32.totalorder %s693_s8, %s897_s4 }
 0x464   :  { %p699_p3 = pnand %p697_p2, %p694_p1 }
 0x466   :  { %702 = shalt.err (!%p699_p3)
}
 0x467   :  { %583 = dma.vmem_to_hbm [thread:$0]  %s581_s30, 32, %s897_s4, [#allocation6]  }
 0x468   :  { %707 = dma.done.wait [#allocation6], 32  }
 0x469   :  { %708 = vsyncadd [#allocation6], 4294967264 }
 0x46a   :  { %587 = vsyncpa [#allocation5], 1 }
 0x46b   :  { %588 = vsyncpa [#allocation8], 1 }
 0x46c   :  { %589 = vsyncpa [#allocation6], 1 }

</bundles_post_ra>
